<compile_context>
chip_gen: v5e
topology: v5e:2x2
jax: 0.10.0
libtpu: 0.0.40
codegen_flags: <defaults>
</compile_context>

<pallas_src>
import math

import jax
import jax.numpy as jnp
import numpy as np
from jax import lax
from jax.experimental import pallas as pl
from jax.experimental.pallas import tpu as pltpu


# ----------------------------------------------------------------------------
# Fused Pallas kernel: all residual blocks in one invocation, one batch-chunk
# of lanes per grid step.
# ----------------------------------------------------------------------------
def make_fused_tcn_kernel(layer_meta, K, Cp, compute_dtype):
    """Refs per grid step:
      x_ref    : (Cp, Nblk)       f32 activations, causal pad baked per sample
      mask_ref : (1,  Nblk)       1.0 on valid lanes, 0.0 on pad lanes (resident)
      wtap_ref : (n_convs*K, Cp, Cp)   per-tap conv weights (resident)
      bias_ref : (n_biases, Cp, 1)     biases, f32 (resident)
      wskip_ref: (n_skip, Cp, Cp)      1x1 skip-conv weights (resident)
      out_ref  : (Cp, Nblk)
    """

    def kernel(x_ref, mask_ref, wtap_ref, bias_ref, wskip_ref, out_ref):
        nblk = x_ref.shape[-1]
        # Hoist the pad-lane mask broadcast once (JAX does not CSE broadcast_in_dim).
        mask = jnp.broadcast_to(mask_ref[...], (Cp, nblk))
        h = x_ref[...]  # f32 (Cp, Nblk); residual path stays f32

        def dconv(h_in, conv_idx, bias_idx, d):
            # Dilated causal conv: K lane-rolled taps (XLU) -> K MXU matmuls
            # accumulated in f32.  Tap k reads x[t - (K-1-k)*d]; contaminated
            # (wrapped / cross-sample) lanes only land in masked pad lanes.
            acc = None
            for k in range(K):
                s = (K - 1 - k) * d
                tap = h_in if s == 0 else pltpu.roll(h_in, shift=s, axis=1)
                part = jnp.dot(wtap_ref[conv_idx * K + k],
                               tap.astype(compute_dtype),
                               preferred_element_type=jnp.float32)
                acc = part if acc is None else acc + part
            return acc + bias_ref[bias_idx]

        ci = bi = si = 0
        for lm in layer_meta:
            d = lm["dilation"]
            # conv1 + relu  (dropout = identity in eval mode)
            y = jnp.maximum(dconv(h, ci, bi, d), 0.0) * mask
            ci += 1
            bi += 1
            # conv2 (+ relu on all but the last block)
            z = dconv(y, ci, bi, d)
            ci += 1
            bi += 1
            if lm["relu2"]:
                z = jnp.maximum(z, 0.0)
            # residual branch (1x1 conv3 on first/last block)
            if lm["has_conv3"]:
                res = jnp.dot(wskip_ref[si], h.astype(compute_dtype),
                              preferred_element_type=jnp.float32) + bias_ref[bi]
                si += 1
                bi += 1
            else:
                res = h
            h = (z + res) * mask          # re-zero pad lanes for the next layer
        out_ref[...] = h.astype(out_ref.dtype)

    return kernel


# ----------------------------------------------------------------------------
# Parameter construction / one-time weight re-layout (hoisted out of forward)
# ----------------------------------------------------------------------------
def resolve_num_layers(num_layers, input_chunk_length, kernel_size, dilation_base):
    if num_layers is None and dilation_base > 1:
        num_layers = math.ceil(math.log(
            (input_chunk_length - 1) * (dilation_base - 1) / (kernel_size - 1) / 2 + 1,
            dilation_base))
    elif num_layers is None:
        num_layers = math.ceil((input_chunk_length - 1) / (kernel_size - 1) / 2)
    return num_layers


def init_conv_params(key, c_out, c_in, k):
    # PyTorch Conv1d default init: U(-1/sqrt(fan_in), 1/sqrt(fan_in))
    fan_in = c_in * k
    bound = 1.0 / math.sqrt(fan_in)
    kw, kb = jax.random.split(key)
    w = jax.random.uniform(kw, (c_out, c_in, k), jnp.float32, -bound, bound)
    b = jax.random.uniform(kb, (c_out,), jnp.float32, -bound, bound)
    return w, b


def init_tcn_params(key, cfg):
    num_layers = cfg["num_layers"]
    params_list = []
    for i in range(num_layers):
        input_dim = cfg["input_size"] if i == 0 else cfg["num_filters"]
        output_dim = cfg["target_size"] if i == num_layers - 1 else cfg["num_filters"]
        key, k1, k2, k3 = jax.random.split(key, 4)
        w1, b1 = init_conv_params(k1, cfg["num_filters"], input_dim, cfg["kernel_size"])
        w2, b2 = init_conv_params(k2, output_dim, cfg["num_filters"], cfg["kernel_size"])
        p = {"w1": w1, "b1": b1, "w2": w2, "b2": b2}
        if i == 0 or i == num_layers - 1:
            w3, b3 = init_conv_params(k3, output_dim, input_dim, 1)
            p["w3"] = w3
            p["b3"] = b3
        params_list.append(p)
    return params_list


def prepare_tcn_inputs(params_list, cfg, use_bf16=False):
    """One-time weight re-layout / packing for the fused kernel."""
    nl = cfg["num_layers"]
    K = cfg["kernel_size"]
    cdt = jnp.bfloat16 if use_bf16 else jnp.float32
    ch_align = 16 if use_bf16 else 8
    cmax = max(cfg["input_size"], cfg["num_filters"], cfg["target_size"])
    Cp = ((cmax + ch_align - 1) // ch_align) * ch_align

    def pad_w_taps(w):  # (Co, Ci, K) -> (K, Cp, Cp), entry k = w[:, :, k] padded
        w = np.asarray(w, np.float32)
        co, ci, k = w.shape
        out = np.zeros((k, Cp, Cp), np.float32)
        out[:, :co, :ci] = np.transpose(w, (2, 0, 1))
        return out

    def pad_b(b):
        b = np.asarray(b, np.float32)
        out = np.zeros((Cp, 1), np.float32)
        out[: b.shape[0], 0] = b
        return out

    wtaps, biases, wskips, meta = [], [], [], []
    for i, p in enumerate(params_list):
        has3 = (i == 0 or i == nl - 1)
        meta.append(dict(dilation=cfg["dilation_base"] ** i,
                         relu2=(i < nl - 1),
                         has_conv3=has3))
        wtaps.append(pad_w_taps(p["w1"]))
        biases.append(pad_b(p["b1"]))
        wtaps.append(pad_w_taps(p["w2"]))
        biases.append(pad_b(p["b2"]))
        if has3:
            w3 = np.asarray(p["w3"], np.float32)[:, :, 0]
            w3p = np.zeros((Cp, Cp), np.float32)
            w3p[: w3.shape[0], : w3.shape[1]] = w3
            wskips.append(w3p)
            biases.append(pad_b(p["b3"]))

    weights = dict(
        wtap=jnp.asarray(np.concatenate(wtaps, axis=0), dtype=cdt),   # (n_convs*K, Cp, Cp)
        bias=jnp.asarray(np.stack(biases, axis=0), dtype=jnp.float32),  # (n_biases, Cp, 1)
        wskip=jnp.asarray(np.stack(wskips, axis=0), dtype=cdt),        # (n_skip, Cp, Cp)
    )
    static = dict(Cp=Cp, compute_dtype=cdt, layer_meta=meta, kernel_size=K)
    return weights, static


# ----------------------------------------------------------------------------
# Forward: single fused pallas_call over a batch-chunk grid
# ----------------------------------------------------------------------------
def tcn_forward_pallas(x, weights, static, cfg, *, samples_per_block=None):
    """x: (B, input_chunk_length, input_size) -> (B, input_chunk_length, target_size)."""
    B, L, C_in = x.shape
    K = static["kernel_size"]
    nl = cfg["num_layers"]
    db = cfg["dilation_base"]
    layer_meta = static["layer_meta"]
    Cp = static["Cp"]
    cdt = static["compute_dtype"]

    Pmax = (db ** (nl - 1)) * (K - 1)
    # Host-side guard: the cross-sample / wraparound contamination argument
    # requires every per-layer tap shift to stay within the baked-in pad.
    max_shift = max((K - 1) * m["dilation"] for m in layer_meta)
    assert max_shift <= Pmax, (max_shift, Pmax)

    Lp = L + Pmax
    if samples_per_block is None:
        samples_per_block = max(1, min(B, 1024 // Lp))   # ~1k-lane tiles
    nb = samples_per_block
    num_blocks = -(-B // nb)
    Bpad = num_blocks * nb
    Nblk = ((nb * Lp + 127) // 128) * 128                # lane-dense block extent
    n_lanes = num_blocks * Nblk

    # Input glue (once per forward): (B,L,C) -> (Cp, Bpad, Lp) with causal left
    # pad, grouped into lane-dense blocks of nb samples.
    h0 = jnp.transpose(x, (2, 0, 1)).astype(jnp.float32)
    h0 = jnp.pad(h0, ((0, Cp - C_in), (0, Bpad - B), (Pmax, 0)))
    h0 = h0.reshape(Cp, num_blocks, nb * Lp)
    h0 = jnp.pad(h0, ((0, 0), (0, 0), (0, Nblk - nb * Lp)))
    h0 = h0.reshape(Cp, n_lanes)

    # Per-block valid-lane mask (identical for every block -> constant index_map,
    # DMA'd once and resident in VMEM).
    lanes = np.arange(Nblk)
    mask = ((lanes < nb * Lp) & (lanes % Lp >= Pmax)).astype(np.float32)[None, :]
    mask = jnp.asarray(mask)

    wtap, bias, wskip = weights["wtap"], weights["bias"], weights["wskip"]

    # Advisory cost + explicit VMEM budget (sized for v7x's 64 MiB physical VMEM).
    n_convs = 2 * nl
    n_skip = wskip.shape[0]
    flops = int(2 * Cp * Cp * n_lanes * (K * n_convs + n_skip))
    bytes_accessed = int(h0.size * 4 + Cp * n_lanes * 4
                         + wtap.size * wtap.dtype.itemsize
                         + wskip.size * wskip.dtype.itemsize
                         + bias.size * 4 + mask.size * 4)
    act_tile = Cp * Nblk * 4
    vmem_est = (12 * act_tile                       # x/out double-buffered + live intermediates
                + wtap.size * wtap.dtype.itemsize
                + wskip.size * wskip.dtype.itemsize
                + bias.shape[0] * 8 * 128 * 4
                + 2 * Nblk * 4)
    vmem_limit = int(min(64 * 1024 * 1024, max(8 * 1024 * 1024, 2 * vmem_est)))

    kernel = make_fused_tcn_kernel(layer_meta, K, Cp, cdt)
    out_flat = pl.pallas_call(
        kernel,
        out_shape=jax.ShapeDtypeStruct((Cp, n_lanes), jnp.float32),
        grid_spec=pltpu.PrefetchScalarGridSpec(
            num_scalar_prefetch=0,
            grid=(num_blocks,),
            in_specs=[
                pl.BlockSpec((Cp, Nblk), lambda i: (0, i)),       # activations: batch-chunk tiled
                pl.BlockSpec((1, Nblk), lambda i: (0, 0)),        # mask: resident
                pl.BlockSpec(wtap.shape, lambda i: (0, 0, 0)),    # packed conv taps: resident
                pl.BlockSpec(bias.shape, lambda i: (0, 0, 0)),    # packed biases: resident
                pl.BlockSpec(wskip.shape, lambda i: (0, 0, 0)),   # packed 1x1 skips: resident
            ],
            out_specs=pl.BlockSpec((Cp, Nblk), lambda i: (0, i)),
        ),
        compiler_params=pltpu.CompilerParams(
            dimension_semantics=("parallel",),
            vmem_limit_bytes=vmem_limit),
        cost_estimate=pl.CostEstimate(flops=flops, transcendentals=0,
                                      bytes_accessed=bytes_accessed),
    )(h0, mask, wtap, bias, wskip)

    out = out_flat.reshape(Cp, num_blocks, Nblk)[:, :, : nb * Lp]
    out = out.reshape(Cp, Bpad, Lp)[: cfg["target_size"], :B, Pmax:]
    out = jnp.transpose(out, (1, 2, 0))                           # (B, L, target)
    return out.reshape(B, cfg["input_chunk_length"], cfg["target_size"])


# ----------------------------------------------------------------------------
# Pure-JAX reference (eval-mode dropout = identity), exact-f32 convolutions
# ----------------------------------------------------------------------------
def ref_conv1d(x, w, b, dilation, left_pad):
    xpad = jnp.pad(x, ((0, 0), (0, 0), (left_pad, 0)))
    out = lax.conv_general_dilated(
        xpad, w, window_strides=(1,), padding="VALID",
        rhs_dilation=(dilation,), dimension_numbers=("NCH", "OIH", "NCH"),
        precision=lax.Precision.HIGHEST)
    return out + b[None, :, None]


def tcn_forward_ref(x, params_list, cfg):
    B = x.shape[0]
    num_layers = cfg["num_layers"]
    h = jnp.transpose(x, (0, 2, 1))
    for i, p in enumerate(params_list):
        d = cfg["dilation_base"] ** i
        P = d * (cfg["kernel_size"] - 1)
        residual = h
        y = jax.nn.relu(ref_conv1d(h, p["w1"], p["b1"], d, P))
        z = ref_conv1d(y, p["w2"], p["b2"], d, P)
        if i < num_layers - 1:
            z = jax.nn.relu(z)
        if i == 0 or i == num_layers - 1:
            residual = ref_conv1d(residual, p["w3"], p["b3"], 1, 0)
        h = z + residual
    out = jnp.transpose(h, (0, 2, 1))
    return out.reshape(B, cfg["input_chunk_length"], cfg["target_size"])


# ----------------------------------------------------------------------------
if __name__ == "__main__":
    cfg = dict(
        input_size=4,
        input_chunk_length=16,
        kernel_size=3,
        num_filters=8,
        num_layers=resolve_num_layers(2, 16, 3, 2),  # -> 2
        dilation_base=2,
        target_size=4,
        target_length=4,   # unused by forward
        dropout=0.0,       # eval mode -> identity
    )

    key = jax.random.PRNGKey(0)
    key, kx, kp = jax.random.split(key, 3)
    x = jax.random.normal(kx, (2, cfg["input_chunk_length"], cfg["input_size"]),
                          dtype=jnp.float32)
    params_list = init_tcn_params(kp, cfg)
    ref = jax.block_until_ready(tcn_forward_ref(x, params_list, cfg))

    # --- f32 MXU path, 2-step parallel grid, tight tolerance ----------------
    # 2e-4 bounds the MXU's multi-pass f32 path worst case while still failing
    # hard on any layout / tap-shift / mask regression.
    w32, s32 = prepare_tcn_inputs(params_list, cfg, use_bf16=False)
    fwd32 = jax.jit(lambda xx, w: tcn_forward_pallas(xx, w, s32, cfg,
                                                     samples_per_block=1))
    out32 = jax.block_until_ready(fwd32(x, w32))
    np.testing.assert_allclose(np.asarray(out32), np.asarray(ref),
                               rtol=2e-4, atol=2e-4)
    assert out32.shape == (2, cfg["input_chunk_length"], cfg["target_size"])

    # --- bf16 MXU path (weights bf16, per-dot activation cast, f32 accum) ---
    wbf, sbf = prepare_tcn_inputs(params_list, cfg, use_bf16=True)
    fwdbf = jax.jit(lambda xx, w: tcn_forward_pallas(xx, w, sbf, cfg))
    outbf = jax.block_until_ready(fwdbf(x, wbf))
    np.testing.assert_allclose(np.asarray(outbf), np.asarray(ref),
                               rtol=5e-2, atol=5e-2)

    print("KERNEL_OK")
</pallas_src>

<mosaic_0001>
module attributes {stable_mosaic.version = 11 : i64} {
  func.func @kernel(%arg0: i32, %arg1: memref<8x128xf32, #tpu.memory_space<vmem>>, %arg2: memref<1x128xf32, #tpu.memory_space<vmem>>, %arg3: memref<12x8x8xf32, #tpu.memory_space<vmem>>, %arg4: memref<6x8x1xf32, #tpu.memory_space<vmem>>, %arg5: memref<2x8x8xf32, #tpu.memory_space<vmem>>, %arg6: memref<8x128xf32, #tpu.memory_space<vmem>>) attributes {dimension_semantics = [#tpu.dimension_semantics<parallel>], iteration_bounds = array<i64: 2>, scalar_prefetch = 0 : i64, scratch_operands = 0 : i64, tpu.core_type = #tpu.core_type<tc>, window_params = [{transform_indices = @transform_0, window_bounds = array<i64: 8, 128>}, {pipeline_mode = #tpu.pipeline_mode<synchronous>, transform_indices = @transform_1, window_bounds = array<i64: 1, 128>}, {pipeline_mode = #tpu.pipeline_mode<synchronous>, transform_indices = @transform_2, window_bounds = array<i64: 12, 8, 8>}, {pipeline_mode = #tpu.pipeline_mode<synchronous>, transform_indices = @transform_3, window_bounds = array<i64: 6, 8, 1>}, {pipeline_mode = #tpu.pipeline_mode<synchronous>, transform_indices = @transform_4, window_bounds = array<i64: 2, 8, 8>}, {transform_indices = @transform_5, window_bounds = array<i64: 8, 128>}]} {
    %c0 = arith.constant 0 : index
    %c0_0 = arith.constant 0 : index
    %0 = vector.load %arg2[%c0, %c0_0] : memref<1x128xf32, #tpu.memory_space<vmem>>, vector<1x128xf32>
    %1 = vector.shape_cast %0 : vector<1x128xf32> to vector<1x128xf32>
    %2 = vector.broadcast %1 : vector<1x128xf32> to vector<8x128xf32>
    %c0_1 = arith.constant 0 : index
    %c0_2 = arith.constant 0 : index
    %3 = vector.load %arg1[%c0_1, %c0_2] : memref<8x128xf32, #tpu.memory_space<vmem>>, vector<8x128xf32>
    %c2_i32 = arith.constant 2 : i32
    %4 = tpu.dynamic_rotate %3 by %c2_i32 dim 1 : vector<8x128xf32>, i32 -> vector<8x128xf32>
    %c0_3 = arith.constant 0 : index
    %c0_4 = arith.constant 0 : index
    %c0_5 = arith.constant 0 : index
    %5 = vector.load %arg3[%c0_3, %c0_4, %c0_5] : memref<12x8x8xf32, #tpu.memory_space<vmem>>, vector<1x8x8xf32>
    %6 = vector.shape_cast %5 : vector<1x8x8xf32> to vector<8x8xf32>
    %cst = arith.constant dense<0.000000e+00> : vector<8x128xf32>
    %7 = tpu.matmul %6, %4, %cst {dimension_numbers = #tpu.dot_dimension_numbers<[1], [0], [0], [1], [0, 0, 1, 1], [], []>} : vector<8x8xf32>, vector<8x128xf32>, vector<8x128xf32> -> vector<8x128xf32>
    %c1_i32 = arith.constant 1 : i32
    %8 = tpu.dynamic_rotate %3 by %c1_i32 dim 1 : vector<8x128xf32>, i32 -> vector<8x128xf32>
    %c1 = arith.constant 1 : index
    %c0_6 = arith.constant 0 : index
    %c0_7 = arith.constant 0 : index
    %9 = vector.load %arg3[%c1, %c0_6, %c0_7] : memref<12x8x8xf32, #tpu.memory_space<vmem>>, vector<1x8x8xf32>
    %10 = vector.shape_cast %9 : vector<1x8x8xf32> to vector<8x8xf32>
    %cst_8 = arith.constant dense<0.000000e+00> : vector<8x128xf32>
    %11 = tpu.matmul %10, %8, %cst_8 {dimension_numbers = #tpu.dot_dimension_numbers<[1], [0], [0], [1], [0, 0, 1, 1], [], []>} : vector<8x8xf32>, vector<8x128xf32>, vector<8x128xf32> -> vector<8x128xf32>
    %12 = arith.addf %7, %11 : vector<8x128xf32>
    %c2 = arith.constant 2 : index
    %c0_9 = arith.constant 0 : index
    %c0_10 = arith.constant 0 : index
    %13 = vector.load %arg3[%c2, %c0_9, %c0_10] : memref<12x8x8xf32, #tpu.memory_space<vmem>>, vector<1x8x8xf32>
    %14 = vector.shape_cast %13 : vector<1x8x8xf32> to vector<8x8xf32>
    %cst_11 = arith.constant dense<0.000000e+00> : vector<8x128xf32>
    %15 = tpu.matmul %14, %3, %cst_11 {dimension_numbers = #tpu.dot_dimension_numbers<[1], [0], [0], [1], [0, 0, 1, 1], [], []>} : vector<8x8xf32>, vector<8x128xf32>, vector<8x128xf32> -> vector<8x128xf32>
    %16 = arith.addf %12, %15 : vector<8x128xf32>
    %c0_12 = arith.constant 0 : index
    %c0_13 = arith.constant 0 : index
    %c0_14 = arith.constant 0 : index
    %17 = vector.load %arg4[%c0_12, %c0_13, %c0_14] : memref<6x8x1xf32, #tpu.memory_space<vmem>>, vector<1x8x1xf32>
    %18 = vector.shape_cast %17 : vector<1x8x1xf32> to vector<8x1xf32>
    %19 = vector.broadcast %18 : vector<8x1xf32> to vector<8x128xf32>
    %20 = arith.addf %16, %19 : vector<8x128xf32>
    %cst_15 = arith.constant 0.000000e+00 : f32
    %21 = vector.broadcast %cst_15 : f32 to vector<8x128xf32>
    %22 = arith.maximumf %20, %21 : vector<8x128xf32>
    %23 = arith.mulf %22, %2 : vector<8x128xf32>
    %c2_i32_16 = arith.constant 2 : i32
    %24 = tpu.dynamic_rotate %23 by %c2_i32_16 dim 1 : vector<8x128xf32>, i32 -> vector<8x128xf32>
    %c3 = arith.constant 3 : index
    %c0_17 = arith.constant 0 : index
    %c0_18 = arith.constant 0 : index
    %25 = vector.load %arg3[%c3, %c0_17, %c0_18] : memref<12x8x8xf32, #tpu.memory_space<vmem>>, vector<1x8x8xf32>
    %26 = vector.shape_cast %25 : vector<1x8x8xf32> to vector<8x8xf32>
    %cst_19 = arith.constant dense<0.000000e+00> : vector<8x128xf32>
    %27 = tpu.matmul %26, %24, %cst_19 {dimension_numbers = #tpu.dot_dimension_numbers<[1], [0], [0], [1], [0, 0, 1, 1], [], []>} : vector<8x8xf32>, vector<8x128xf32>, vector<8x128xf32> -> vector<8x128xf32>
    %c1_i32_20 = arith.constant 1 : i32
    %28 = tpu.dynamic_rotate %23 by %c1_i32_20 dim 1 : vector<8x128xf32>, i32 -> vector<8x128xf32>
    %c4 = arith.constant 4 : index
    %c0_21 = arith.constant 0 : index
    %c0_22 = arith.constant 0 : index
    %29 = vector.load %arg3[%c4, %c0_21, %c0_22] : memref<12x8x8xf32, #tpu.memory_space<vmem>>, vector<1x8x8xf32>
    %30 = vector.shape_cast %29 : vector<1x8x8xf32> to vector<8x8xf32>
    %cst_23 = arith.constant dense<0.000000e+00> : vector<8x128xf32>
    %31 = tpu.matmul %30, %28, %cst_23 {dimension_numbers = #tpu.dot_dimension_numbers<[1], [0], [0], [1], [0, 0, 1, 1], [], []>} : vector<8x8xf32>, vector<8x128xf32>, vector<8x128xf32> -> vector<8x128xf32>
    %32 = arith.addf %27, %31 : vector<8x128xf32>
    %c5 = arith.constant 5 : index
    %c0_24 = arith.constant 0 : index
    %c0_25 = arith.constant 0 : index
    %33 = vector.load %arg3[%c5, %c0_24, %c0_25] : memref<12x8x8xf32, #tpu.memory_space<vmem>>, vector<1x8x8xf32>
    %34 = vector.shape_cast %33 : vector<1x8x8xf32> to vector<8x8xf32>
    %cst_26 = arith.constant dense<0.000000e+00> : vector<8x128xf32>
    %35 = tpu.matmul %34, %23, %cst_26 {dimension_numbers = #tpu.dot_dimension_numbers<[1], [0], [0], [1], [0, 0, 1, 1], [], []>} : vector<8x8xf32>, vector<8x128xf32>, vector<8x128xf32> -> vector<8x128xf32>
    %36 = arith.addf %32, %35 : vector<8x128xf32>
    %c1_27 = arith.constant 1 : index
    %c0_28 = arith.constant 0 : index
    %c0_29 = arith.constant 0 : index
    %37 = vector.load %arg4[%c1_27, %c0_28, %c0_29] : memref<6x8x1xf32, #tpu.memory_space<vmem>>, vector<1x8x1xf32>
    %38 = vector.shape_cast %37 : vector<1x8x1xf32> to vector<8x1xf32>
    %39 = vector.broadcast %38 : vector<8x1xf32> to vector<8x128xf32>
    %40 = arith.addf %36, %39 : vector<8x128xf32>
    %cst_30 = arith.constant 0.000000e+00 : f32
    %41 = vector.broadcast %cst_30 : f32 to vector<8x128xf32>
    %42 = arith.maximumf %40, %41 : vector<8x128xf32>
    %c0_31 = arith.constant 0 : index
    %c0_32 = arith.constant 0 : index
    %c0_33 = arith.constant 0 : index
    %43 = vector.load %arg5[%c0_31, %c0_32, %c0_33] : memref<2x8x8xf32, #tpu.memory_space<vmem>>, vector<1x8x8xf32>
    %44 = vector.shape_cast %43 : vector<1x8x8xf32> to vector<8x8xf32>
    %cst_34 = arith.constant dense<0.000000e+00> : vector<8x128xf32>
    %45 = tpu.matmul %44, %3, %cst_34 {dimension_numbers = #tpu.dot_dimension_numbers<[1], [0], [0], [1], [0, 0, 1, 1], [], []>} : vector<8x8xf32>, vector<8x128xf32>, vector<8x128xf32> -> vector<8x128xf32>
    %c2_35 = arith.constant 2 : index
    %c0_36 = arith.constant 0 : index
    %c0_37 = arith.constant 0 : index
    %46 = vector.load %arg4[%c2_35, %c0_36, %c0_37] : memref<6x8x1xf32, #tpu.memory_space<vmem>>, vector<1x8x1xf32>
    %47 = vector.shape_cast %46 : vector<1x8x1xf32> to vector<8x1xf32>
    %48 = vector.broadcast %47 : vector<8x1xf32> to vector<8x128xf32>
    %49 = arith.addf %45, %48 : vector<8x128xf32>
    %50 = arith.addf %42, %49 : vector<8x128xf32>
    %51 = arith.mulf %50, %2 : vector<8x128xf32>
    %c4_i32 = arith.constant 4 : i32
    %52 = tpu.dynamic_rotate %51 by %c4_i32 dim 1 : vector<8x128xf32>, i32 -> vector<8x128xf32>
    %c6 = arith.constant 6 : index
    %c0_38 = arith.constant 0 : index
    %c0_39 = arith.constant 0 : index
    %53 = vector.load %arg3[%c6, %c0_38, %c0_39] : memref<12x8x8xf32, #tpu.memory_space<vmem>>, vector<1x8x8xf32>
    %54 = vector.shape_cast %53 : vector<1x8x8xf32> to vector<8x8xf32>
    %cst_40 = arith.constant dense<0.000000e+00> : vector<8x128xf32>
    %55 = tpu.matmul %54, %52, %cst_40 {dimension_numbers = #tpu.dot_dimension_numbers<[1], [0], [0], [1], [0, 0, 1, 1], [], []>} : vector<8x8xf32>, vector<8x128xf32>, vector<8x128xf32> -> vector<8x128xf32>
    %c2_i32_41 = arith.constant 2 : i32
    %56 = tpu.dynamic_rotate %51 by %c2_i32_41 dim 1 : vector<8x128xf32>, i32 -> vector<8x128xf32>
    %c7 = arith.constant 7 : index
    %c0_42 = arith.constant 0 : index
    %c0_43 = arith.constant 0 : index
    %57 = vector.load %arg3[%c7, %c0_42, %c0_43] : memref<12x8x8xf32, #tpu.memory_space<vmem>>, vector<1x8x8xf32>
    %58 = vector.shape_cast %57 : vector<1x8x8xf32> to vector<8x8xf32>
    %cst_44 = arith.constant dense<0.000000e+00> : vector<8x128xf32>
    %59 = tpu.matmul %58, %56, %cst_44 {dimension_numbers = #tpu.dot_dimension_numbers<[1], [0], [0], [1], [0, 0, 1, 1], [], []>} : vector<8x8xf32>, vector<8x128xf32>, vector<8x128xf32> -> vector<8x128xf32>
    %60 = arith.addf %55, %59 : vector<8x128xf32>
    %c8 = arith.constant 8 : index
    %c0_45 = arith.constant 0 : index
    %c0_46 = arith.constant 0 : index
    %61 = vector.load %arg3[%c8, %c0_45, %c0_46] : memref<12x8x8xf32, #tpu.memory_space<vmem>>, vector<1x8x8xf32>
    %62 = vector.shape_cast %61 : vector<1x8x8xf32> to vector<8x8xf32>
    %cst_47 = arith.constant dense<0.000000e+00> : vector<8x128xf32>
    %63 = tpu.matmul %62, %51, %cst_47 {dimension_numbers = #tpu.dot_dimension_numbers<[1], [0], [0], [1], [0, 0, 1, 1], [], []>} : vector<8x8xf32>, vector<8x128xf32>, vector<8x128xf32> -> vector<8x128xf32>
    %64 = arith.addf %60, %63 : vector<8x128xf32>
    %c3_48 = arith.constant 3 : index
    %c0_49 = arith.constant 0 : index
    %c0_50 = arith.constant 0 : index
    %65 = vector.load %arg4[%c3_48, %c0_49, %c0_50] : memref<6x8x1xf32, #tpu.memory_space<vmem>>, vector<1x8x1xf32>
    %66 = vector.shape_cast %65 : vector<1x8x1xf32> to vector<8x1xf32>
    %67 = vector.broadcast %66 : vector<8x1xf32> to vector<8x128xf32>
    %68 = arith.addf %64, %67 : vector<8x128xf32>
    %cst_51 = arith.constant 0.000000e+00 : f32
    %69 = vector.broadcast %cst_51 : f32 to vector<8x128xf32>
    %70 = arith.maximumf %68, %69 : vector<8x128xf32>
    %71 = arith.mulf %70, %2 : vector<8x128xf32>
    %c4_i32_52 = arith.constant 4 : i32
    %72 = tpu.dynamic_rotate %71 by %c4_i32_52 dim 1 : vector<8x128xf32>, i32 -> vector<8x128xf32>
    %c9 = arith.constant 9 : index
    %c0_53 = arith.constant 0 : index
    %c0_54 = arith.constant 0 : index
    %73 = vector.load %arg3[%c9, %c0_53, %c0_54] : memref<12x8x8xf32, #tpu.memory_space<vmem>>, vector<1x8x8xf32>
    %74 = vector.shape_cast %73 : vector<1x8x8xf32> to vector<8x8xf32>
    %cst_55 = arith.constant dense<0.000000e+00> : vector<8x128xf32>
    %75 = tpu.matmul %74, %72, %cst_55 {dimension_numbers = #tpu.dot_dimension_numbers<[1], [0], [0], [1], [0, 0, 1, 1], [], []>} : vector<8x8xf32>, vector<8x128xf32>, vector<8x128xf32> -> vector<8x128xf32>
    %c2_i32_56 = arith.constant 2 : i32
    %76 = tpu.dynamic_rotate %71 by %c2_i32_56 dim 1 : vector<8x128xf32>, i32 -> vector<8x128xf32>
    %c10 = arith.constant 10 : index
    %c0_57 = arith.constant 0 : index
    %c0_58 = arith.constant 0 : index
    %77 = vector.load %arg3[%c10, %c0_57, %c0_58] : memref<12x8x8xf32, #tpu.memory_space<vmem>>, vector<1x8x8xf32>
    %78 = vector.shape_cast %77 : vector<1x8x8xf32> to vector<8x8xf32>
    %cst_59 = arith.constant dense<0.000000e+00> : vector<8x128xf32>
    %79 = tpu.matmul %78, %76, %cst_59 {dimension_numbers = #tpu.dot_dimension_numbers<[1], [0], [0], [1], [0, 0, 1, 1], [], []>} : vector<8x8xf32>, vector<8x128xf32>, vector<8x128xf32> -> vector<8x128xf32>
    %80 = arith.addf %75, %79 : vector<8x128xf32>
    %c11 = arith.constant 11 : index
    %c0_60 = arith.constant 0 : index
    %c0_61 = arith.constant 0 : index
    %81 = vector.load %arg3[%c11, %c0_60, %c0_61] : memref<12x8x8xf32, #tpu.memory_space<vmem>>, vector<1x8x8xf32>
    %82 = vector.shape_cast %81 : vector<1x8x8xf32> to vector<8x8xf32>
    %cst_62 = arith.constant dense<0.000000e+00> : vector<8x128xf32>
    %83 = tpu.matmul %82, %71, %cst_62 {dimension_numbers = #tpu.dot_dimension_numbers<[1], [0], [0], [1], [0, 0, 1, 1], [], []>} : vector<8x8xf32>, vector<8x128xf32>, vector<8x128xf32> -> vector<8x128xf32>
    %84 = arith.addf %80, %83 : vector<8x128xf32>
    %c4_63 = arith.constant 4 : index
    %c0_64 = arith.constant 0 : index
    %c0_65 = arith.constant 0 : index
    %85 = vector.load %arg4[%c4_63, %c0_64, %c0_65] : memref<6x8x1xf32, #tpu.memory_space<vmem>>, vector<1x8x1xf32>
    %86 = vector.shape_cast %85 : vector<1x8x1xf32> to vector<8x1xf32>
    %87 = vector.broadcast %86 : vector<8x1xf32> to vector<8x128xf32>
    %88 = arith.addf %84, %87 : vector<8x128xf32>
    %c1_66 = arith.constant 1 : index
    %c0_67 = arith.constant 0 : index
    %c0_68 = arith.constant 0 : index
    %89 = vector.load %arg5[%c1_66, %c0_67, %c0_68] : memref<2x8x8xf32, #tpu.memory_space<vmem>>, vector<1x8x8xf32>
    %90 = vector.shape_cast %89 : vector<1x8x8xf32> to vector<8x8xf32>
    %cst_69 = arith.constant dense<0.000000e+00> : vector<8x128xf32>
    %91 = tpu.matmul %90, %51, %cst_69 {dimension_numbers = #tpu.dot_dimension_numbers<[1], [0], [0], [1], [0, 0, 1, 1], [], []>} : vector<8x8xf32>, vector<8x128xf32>, vector<8x128xf32> -> vector<8x128xf32>
    %c5_70 = arith.constant 5 : index
    %c0_71 = arith.constant 0 : index
    %c0_72 = arith.constant 0 : index
    %92 = vector.load %arg4[%c5_70, %c0_71, %c0_72] : memref<6x8x1xf32, #tpu.memory_space<vmem>>, vector<1x8x1xf32>
    %93 = vector.shape_cast %92 : vector<1x8x1xf32> to vector<8x1xf32>
    %94 = vector.broadcast %93 : vector<8x1xf32> to vector<8x128xf32>
    %95 = arith.addf %91, %94 : vector<8x128xf32>
    %96 = arith.addf %88, %95 : vector<8x128xf32>
    %97 = arith.mulf %96, %2 : vector<8x128xf32>
    %c0_73 = arith.constant 0 : index
    %c0_74 = arith.constant 0 : index
    %98 = vector.load %arg6[%c0_73, %c0_74] : memref<8x128xf32, #tpu.memory_space<vmem>>, vector<8x128xf32>
    tpu.vector_store %arg6[%c0_73, %c0_74], %97 {strides = array<i32>} : memref<8x128xf32, #tpu.memory_space<vmem>>, vector<8x128xf32>,
    return
  }
  func.func @transform_0(%arg0: i32) -> (i32, i32) {
    %c0_i32 = arith.constant 0 : i32
    %c0_i32_0 = arith.constant 0 : i32
    return %c0_i32, %arg0 : i32, i32
  }
  func.func @transform_1(%arg0: i32) -> (i32, i32) {
    %c0_i32 = arith.constant 0 : i32
    %c0_i32_0 = arith.constant 0 : i32
    %c0_i32_1 = arith.constant 0 : i32
    return %c0_i32, %c0_i32_0 : i32, i32
  }
  func.func @transform_2(%arg0: i32) -> (i32, i32, i32) {
    %c0_i32 = arith.constant 0 : i32
    %c0_i32_0 = arith.constant 0 : i32
    %c0_i32_1 = arith.constant 0 : i32
    %c0_i32_2 = arith.constant 0 : i32
    return %c0_i32, %c0_i32_0, %c0_i32_1 : i32, i32, i32
  }
  func.func @transform_3(%arg0: i32) -> (i32, i32, i32) {
    %c0_i32 = arith.constant 0 : i32
    %c0_i32_0 = arith.constant 0 : i32
    %c0_i32_1 = arith.constant 0 : i32
    %c0_i32_2 = arith.constant 0 : i32
    return %c0_i32, %c0_i32_0, %c0_i32_1 : i32, i32, i32
  }
  func.func @transform_4(%arg0: i32) -> (i32, i32, i32) {
    %c0_i32 = arith.constant 0 : i32
    %c0_i32_0 = arith.constant 0 : i32
    %c0_i32_1 = arith.constant 0 : i32
    %c0_i32_2 = arith.constant 0 : i32
    return %c0_i32, %c0_i32_0, %c0_i32_1 : i32, i32, i32
  }
  func.func @transform_5(%arg0: i32) -> (i32, i32) {
    %c0_i32 = arith.constant 0 : i32
    %c0_i32_0 = arith.constant 0 : i32
    return %c0_i32, %arg0 : i32, i32
  }
}

</mosaic_0001>

<bundles_post_ra>
// kernel: _lambda_.1
= control target key start
LH: loop header
LB: loop body
LE: loop exit
PB: predicated region body
PF: predicated region fallthrough
CT: control target
= control target key end

     0   :  { %s800_s18 = smov 0   ;;  %s915_s0 = inlined_call_operand.vmem [shape: f32[8,256], index: 0, kind: input, shape index: {}]   ;;  %s916_s1 = inlined_call_operand.vmem [shape: f32[1,128], index: 1, kind: input, shape index: {}]   ;;  %s917_s2 = inlined_call_operand.vmem [shape: f32[12,8,8], index: 2, kind: input, shape index: {}]   ;;  %s918_s3 = inlined_call_operand.vmem [shape: f32[6,8,1], index: 3, kind: input, shape index: {}]   ;;  %s919_s4 = inlined_call_operand.vmem [shape: f32[2,8,8], index: 4, kind: input, shape index: {}]   ;;  %s920_s5 = inlined_call_operand.vmem [shape: f32[8,256], index: 5, kind: output, shape index: {}]  }
   0x1 LB: > { %s702_s19 = sadd.s32 4294967295, %s764_s18   ;;  %p706_p0 = scmp.ge.s32.totalorder %s764_s18, 1  ;;  %s764_s18 = sphi %s800_s18, %s15_s18  }
   0x2   : > { %p186_p1 = scmp.lt.s32.totalorder %s764_s18, 3 }
   0x4   : > { %p187_p2 = pnand %p706_p0, %p186_p1 }
   0x5   : > { %p212_p3 = scmp.lt.s32.totalorder (!%p187_p2), %s702_s19, 1  ;;  %s766_s24 = smov (!%p187_p2), 2  }
   0x6   : > { %190 = sbr.rel (%p187_p2) target bundleno = 1052 (0x41c), region = 40  ;;  %s767_s25 = smov (!%p187_p2), 1  }
   0x7   : > { %s769_s27 = smov (!%p187_p2), 4  }
   0xb   : > { %s922_s19 = smov (!%p212_p3, %s702_s19), 1  ;;  %vm232_vm0 = vcmask 64512   ;;  %v712_v1 = vld [vmem:[%s917_s2 + $0x10] sm:$0xff]  ;;  %v305_v2 = vld [vmem:[%s918_s3] sm:$0xff]  ;;  %v768_v3 = vmov 0   ;;  %v709_v6 = vld [vmem:[%s917_s2 + $0x8] sm:$0xff] }
   0xc   : > { %s707_s20 = sshll.u32 %s922_s19, 3  ;;  %754 = vset.pattern.permute.xlu1 %v768_v3  ;;  %756 = vset.pattern.permute.xlu0 %v768_v3  ;;  %v227_v4 = vld [vmem:[%s917_s2] sm:$0xff]  ;;  %v718_v19 = vld [vmem:[%s917_s2 + $0x28] sm:$0xff]  ;;  %v721_v20 = vld [vmem:[%s918_s3 + $0x10] sm:$0xff] }
   0xd   : > { %s215_s23 = scalar_lea.vmem %s915_s0, %s707_s20  ;;  %308 = vperm.xlu1 %754, %v305_v2   ;;  %755 = vset.pattern.permute.xlu2 %v768_v3  ;;  %v836_v14 = vld [vmem:[%s916_s1] ss:$0 sm:$0xff]  ;;  %v720_v21 = vld [vmem:[%s918_s3 + $0x8] sm:$0xff]  ;;  %v714_v22 = vld [vmem:[%s917_s2 + $0x18] sm:$0xff]  ;;  %s219_s28 = scalar_lea.vmem %s920_s5, %s707_s20 }
   0xe   : > { %v224_v0 = vld [vmem:[%s215_s23] sm:$0xff]  ;;  %v729_v39 = vld [vmem:[%s918_s3 + $0x18] sm:$0xff]  ;;  %v723_v41 = vld [vmem:[%s917_s2 + $0x30] sm:$0xff] }
   0xf   : > { %225 = vrot.lane.b32.xlu0 %v224_v0, %s766_s24  ;;  %299 = vmatpush.msra.mxu2 %v224_v0  ;;  %v403_v18 = vld [vmem:[%s919_s4] sm:$0xff]  ;;  %v737_v44 = vld [vmem:[%s919_s4 + $0x8] sm:$0xff]  ;;  %v724_v45 = vld [vmem:[%s917_s2 + $0x38] sm:$0xff] }
  0x10   : > { %713 = vmatmul.msk.f32.vlgmr.msra.gmra.mxu2 %vm232_vm0, %v712_v1  ;;  %v715_v24 = vld [vmem:[%s917_s2 + $0x20] sm:$0xff]  ;;  %v738_v56 = vld [vmem:[%s918_s3 + $0x28] sm:$0xff]  ;;  %v734_v57 = vld [vmem:[%s917_s2 + $0x58] sm:$0xff] }
  0x11   : > { %429 = vmatpush.msrb.mxu2 %v224_v0  ;;  %v736_v40 = vld [vmem:[%s918_s3 + $0x20] sm:$0xff]  ;;  %v730_v58 = vld [vmem:[%s917_s2 + $0x48] sm:$0xff]  ;;  %v731_v60 = vld [vmem:[%s917_s2 + $0x50] sm:$0xff] }
  0x12   : > { %v727_v43 = vld [vmem:[%s917_s2 + $0x40] sm:$0xff] }
  0x17   : > { %228 = vrot.lane.b32.xlu0 %v224_v0, %s767_s25 }
  0x18   : > { %722 = vmatmul.msk.f32.vlgmr.msrb.gmra.mxu2 %vm232_vm0, %v403_v18 }
  0x1f   : > { %408 = vperm.xlu0 %756, %v721_v20  }
  0x7f   : > { %v309_v12 = vpop.permute.xlu1 %308 }
  0x81   : > { %v226_v5 = vpop.permute.xlu0 %225 }
  0x82   : > { %274 = vmatpush.msra.mxu1 %v226_v5 }
  0x83   : > { %711 = vmatmul.msk.f32.vlgmr.msra.gmra.mxu1 %vm232_vm0, %v227_v4 }
  0x89   : > { %v229_v7 = vpop.permute.xlu0 %228 }
  0x8a   : > { %251 = vmatpush.msra.mxu0 %v229_v7 }
  0x8b   : > { %710 = vmatmul.msk.f32.vlgmr.msra.gmra.mxu0 %vm232_vm0, %v709_v6 }
  0x91   : > { %v409_v31 = vpop.permute.xlu0 %408 }
  0x93   : > { %v301_v10 = vpop.f32.mrf.mxu2 }
  0x9b   : > { %v431_v32 = vpop.f32.mrf.mxu2 }
  0x9c   : > { %v432_v35 = vadd.f32 %v431_v32, %v409_v31 }
 0x100   : > { %v276_v8 = vpop.f32.mrf.mxu1 }
 0x108   : > { %v253_v9 = vpop.f32.mrf.mxu0 }
 0x109   : > { %v277_v11 = vadd.f32 %v276_v8, %v253_v9 }
 0x10b   : > { %v304_v13 = vadd.f32 %v301_v10, %v277_v11 }
 0x10d   : > { %v311_v15 = vadd.f32 %v309_v12, %v304_v13 }
 0x10f   : > { %v312_v16 = vmax.f32 %v311_v15, 0.0 }
 0x111   : > { %v313_v17 = vmul.f32 %v836_v14, %v312_v16 }
 0x113   : > { %314 = vrot.lane.b32.xlu2 %v313_v17, %s766_s24  ;;  %318 = vrot.lane.b32.xlu1 %v313_v17, %s767_s25 }
 0x114   : > { %388 = vmatpush.msrb.mxu1 %v313_v17 }
 0x115   : > { %719 = vmatmul.msk.f32.vlgmr.msrb.gmra.mxu1 %vm232_vm0, %v718_v19 }
 0x11b   : > { %398 = vperm.xlu2 %755, %v720_v21  }
 0x16d   : > { %v315_v23 = vpop.permute.xlu2 %314 }
 0x16e   : > { %363 = vmatpush.msrb.mxu0 %v315_v23 }
 0x16f   : > { %717 = vmatmul.msk.f32.vlgmr.msrb.gmra.mxu0 %vm232_vm0, %v714_v22 }
 0x175   : > { %v399_v30 = vpop.permute.xlu2 %398 }
 0x185   : > { %v319_v25 = vpop.permute.xlu1 %318 }
 0x186   : > { %340 = vmatpush.msra.mxu3 %v319_v25 }
 0x187   : > { %716 = vmatmul.msk.f32.vlgmr.msra.gmra.mxu3 %vm232_vm0, %v715_v24 }
 0x192   : > { %v390_v28 = vpop.f32.mrf.mxu1 }
 0x1ec   : > { %v365_v26 = vpop.f32.mrf.mxu0 }
 0x20a   : > { %v342_v27 = vpop.f32.mrf.mxu3 }
 0x20b   : > { %v366_v29 = vadd.f32 %v365_v26, %v342_v27 }
 0x20d   : > { %v393_v33 = vadd.f32 %v390_v28, %v366_v29 }
 0x20f   : > { %v401_v34 = vadd.f32 %v399_v30, %v393_v33 }
 0x211   : > { %v402_v36 = vmax.f32 %v401_v34, 0.0 }
 0x213   : > { %v434_v37 = vadd.f32 %v432_v35, %v402_v36 }
 0x215   : > { %v435_v38 = vmul.f32 %v836_v14, %v434_v37 }
 0x217   : > { %436 = vrot.lane.b32.xlu2 %v435_v38, %s769_s27  ;;  %440 = vrot.lane.b32.xlu1 %v435_v38, %s766_s24 }
 0x218   : > { %510 = vmatpush.msra.mxu1 %v435_v38 }
 0x219   : > { %728 = vmatmul.msk.f32.vlgmr.msra.gmra.mxu1 %vm232_vm0, %v727_v43 }
 0x21a   : > { %641 = vmatpush.msrb.mxu1 %v435_v38 }
 0x21f   : > { %520 = vperm.xlu1 %754, %v729_v39  }
 0x221   : > { %739 = vmatmul.msk.f32.vlgmr.msrb.gmra.mxu1 %vm232_vm0, %v737_v44 }
 0x227   : > { %610 = vperm.xlu1 %754, %v736_v40  }
 0x271   : > { %v437_v42 = vpop.permute.xlu2 %436 }
 0x272   : > { %485 = vmatpush.msra.mxu0 %v437_v42 }
 0x273   : > { %726 = vmatmul.msk.f32.vlgmr.msra.gmra.mxu0 %vm232_vm0, %v723_v41 }
 0x289   : > { %v441_v46 = vpop.permute.xlu1 %440 }
 0x28a   : > { %462 = vmatpush.msrb.mxu3 %v441_v46 }
 0x28b   : > { %725 = vmatmul.msk.f32.vlgmr.msrb.gmra.mxu3 %vm232_vm0, %v724_v45 }
 0x291   : > { %v521_v52 = vpop.permute.xlu1 %520 }
 0x296   : > { %v512_v49 = vpop.f32.mrf.mxu1 }
 0x299   : > { %v611_v5 = vpop.permute.xlu1 %610 }
 0x29e   : > { %v643_v2 = vpop.f32.mrf.mxu1 }
 0x2f0   : > { %v487_v47 = vpop.f32.mrf.mxu0 }
 0x30e   : > { %v464_v48 = vpop.f32.mrf.mxu3 }
 0x30f   : > { %v488_v50 = vadd.f32 %v487_v47, %v464_v48 }
 0x311   : > { %v515_v51 = vadd.f32 %v512_v49, %v488_v50 }
 0x313   : > { %v523_v53 = vadd.f32 %v521_v52, %v515_v51 }
 0x315   : > { %v524_v54 = vmax.f32 %v523_v53, 0.0 }
 0x317   : > { %v525_v55 = vmul.f32 %v836_v14, %v524_v54 }
 0x319   : > { %530 = vrot.lane.b32.xlu0 %v525_v55, %s766_s24  ;;  %526 = vrot.lane.b32.xlu2 %v525_v55, %s769_s27 }
 0x31a   : > { %600 = vmatpush.msrb.mxu0 %v525_v55 }
 0x31b   : > { %735 = vmatmul.msk.f32.vlgmr.msrb.gmra.mxu0 %vm232_vm0, %v734_v57 }
 0x321   : > { %620 = vperm.xlu2 %755, %v738_v56  }
 0x373   : > { %v527_v59 = vpop.permute.xlu2 %526 }
 0x374   : > { %575 = vmatpush.msra.mxu3 %v527_v59 }
 0x375   : > { %733 = vmatmul.msk.f32.vlgmr.msra.gmra.mxu3 %vm232_vm0, %v730_v58 }
 0x37b   : > { %v621_v3 = vpop.permute.xlu2 %620 }
 0x37c   : > { %v644_v6 = vadd.f32 %v643_v2, %v621_v3 }
 0x38b   : > { %v531_v61 = vpop.permute.xlu0 %530 }
 0x38c   : > { %552 = vmatpush.msra.mxu2 %v531_v61 }
 0x38d   : > { %732 = vmatmul.msk.f32.vlgmr.msra.gmra.mxu2 %vm232_vm0, %v731_v60 }
 0x398   : > { %v602_v0 = vpop.f32.mrf.mxu0 }
 0x3f8   : > { %v577_v62 = vpop.f32.mrf.mxu3 }
 0x410   : > { %v554_v63 = vpop.f32.mrf.mxu2 }
 0x411   : > { %v578_v1 = vadd.f32 %v577_v62, %v554_v63 }
 0x413   : > { %v605_v4 = vadd.f32 %v602_v0, %v578_v1 }
 0x415   : > { %v613_v7 = vadd.f32 %v611_v5, %v605_v4 }
 0x417   : > { %v646_v8 = vadd.f32 %v644_v6, %v613_v7 }
 0x419   : > { %v647_v9 = vmul.f32 %v836_v14, %v646_v8 }
 0x41b   : > { %648 = vst [vmem:[%s219_s28] sm:$0xff] %v647_v9 }
 0x41c PF: > { %s15_s18 = sadd.s32 1, %s764_s18  }
 0x41d   : > { %p12_p4 = scmp.ge.s32.totalorder %s15_s18, 4  }
 0x41f   :  { %14 = sbr.rel (!%p12_p4) target bundleno = 1 (0x1), region = 87 }

</bundles_post_ra>
